<compile_context>
chip_gen: v5e
topology: v5e:2x2
jax: 0.10.0
libtpu: 0.0.40
codegen_flags: <defaults>
</compile_context>

<pallas_src>
import math

import jax
import jax.numpy as jnp
from jax.experimental import pallas as pl
from jax.experimental.pallas import tpu as pltpu

EPS = 1e-12  # LayerNorm eps of the PyTorch module (module defines EPS = 1e-12)


def _gelu(x):
    return jax.nn.gelu(x, approximate=True)


def _layer_norm(x, gamma, beta):
    """LayerNorm over the last axis (embed_dim), f32 math."""
    mu = jnp.mean(x, axis=-1, keepdims=True)
    xc = x - mu
    var = jnp.mean(xc * xc, axis=-1, keepdims=True)
    return xc * jax.lax.rsqrt(var + EPS) * gamma + beta


def _make_mixer_kernel(tb, num_patches):
    """Kernel body for a fixed batch tile `tb` (token loop is unrolled over it)."""
    P = num_patches

    def kernel(x_ref,
               g1_ref, b1_ref,           # token-mixer LayerNorm        (1, D)
               wt1_ref, bt1_ref,         # token MLP Linear(P -> Ht):   (Ht, P), (Ht, 1)
               wt2_ref, bt2_ref,         # token MLP Linear(Ht -> P):   (P, Ht), (P, 1)
               g2_ref, b2_ref,           # channel-mixer LayerNorm      (1, D)
               wc1_ref, bc1_ref,         # channel MLP Linear(D -> Hc): (D, Hc), (1, Hc)
               wc2_ref, bc2_ref,         # channel MLP Linear(Hc -> D): (Hc, D), (1, D)
               o_ref,                    # (tb*P, D)
               x1_ref):                  # VMEM scratch (tb*P, D) f32
        f32 = jnp.float32
        mm_dtype = wt1_ref.dtype          # MXU operand dtype (bf16 weights -> bf16 ops)

        x = x_ref[...].astype(f32)        # (R, D) with R = tb*P; embed stays on lanes

        # ---------------- token mixer (mix over the patch axis) -------------
        u = _layer_norm(x, g1_ref[...], b1_ref[...]).astype(mm_dtype)
        wt1 = wt1_ref[...]                # (Ht, P)  resident, used as-is (no replication)
        wt2 = wt2_ref[...]                # (P, Ht)
        bt1 = bt1_ref[...]                # (Ht, 1) f32
        bt2 = bt2_ref[...]                # (P, 1)  f32
        for b in range(tb):               # short unrolled loop of 2-D MXU matmuls
            ub = u[b * P:(b + 1) * P, :]                                   # (P, D)
            hb = jnp.dot(wt1, ub, preferred_element_type=f32) + bt1        # (Ht, D)
            hb = _gelu(hb).astype(mm_dtype)
            tk = jnp.dot(wt2, hb, preferred_element_type=f32) + bt2        # (P, D)
            x1_ref[pl.ds(b * P, P), :] = x[b * P:(b + 1) * P, :] + tk      # residual 1

        # ---------------- channel mixer (flat 2-D matmuls, M = tb*P) --------
        x1 = x1_ref[...]                                                   # (R, D) f32
        v = _layer_norm(x1, g2_ref[...], b2_ref[...]).astype(mm_dtype)
        h2 = jnp.dot(v, wc1_ref[...], preferred_element_type=f32)          # (R, Hc)
        h2 = _gelu(h2 + bc1_ref[...]).astype(mm_dtype)
        c = jnp.dot(h2, wc2_ref[...], preferred_element_type=f32)          # (R, D)
        c = c + bc2_ref[...]

        # NOTE: for embed_dim < 128 this store is lane-masked (partial vst);
        # it is lane-dense whenever embed_dim is a multiple of 128.
        o_ref[...] = (x1 + c).astype(o_ref.dtype)                          # residual 2

    return kernel


def _round_up(a, m):
    return -(-a // m) * m


def _vmem_limit_bytes():
    cap = None
    try:
        cap = getattr(pltpu.get_tpu_info(), "vmem_capacity_bytes", None)
    except Exception:
        cap = None
    if not cap:
        cap = 64 * 1024 * 1024  # conservative default (v7x per-core VMEM)
    # leave headroom for compiler scratch; 96 MiB on v5e/v6e, ~48 MiB on v7x
    return int(max(32 * 1024 * 1024, min(100 * 1024 * 1024, (cap * 3) // 4)))


def mlp_mixer_block1d(x, params, *, block_batch=None,
                      target_tile_bytes=2 << 20, max_token_unroll=16):
    """Pallas equivalent of MLPMixerBlock1d.forward.

    Args:
        x: (batch_size, num_patches, embed_dim)
        params: dict of weights in PyTorch nn.Linear / nn.LayerNorm convention:
            g1, b1, g2, b2 : (D,)          LayerNorm weight / bias
            wt1 (Ht, P), bt1 (Ht,)         token MLP Linear(P -> Ht)
            wt2 (P, Ht), bt2 (P,)          token MLP Linear(Ht -> P)
            wc1 (Hc, D), bc1 (Hc,)         channel MLP Linear(D -> Hc)
            wc2 (D, Hc), bc2 (D,)          channel MLP Linear(Hc -> D)
    Returns:
        (batch_size, num_patches, embed_dim)
    """
    B, P, D = x.shape
    Ht = params["wt1"].shape[0]
    Hc = params["wc1"].shape[0]
    itemsize = x.dtype.itemsize
    f32 = jnp.float32
    # MXU operand dtype: bf16 stays bf16 (v6e/v7x want bf16 operands), else f32.
    w_dtype = jnp.bfloat16 if x.dtype == jnp.bfloat16 else jnp.float32

    # Kernel-friendly layouts, cast ONCE here (not per grid step in-kernel).
    g1 = jnp.asarray(params["g1"]).reshape(1, D).astype(f32)
    b1 = jnp.asarray(params["b1"]).reshape(1, D).astype(f32)
    wt1 = jnp.asarray(params["wt1"]).astype(w_dtype)            # (Ht, P)
    bt1 = jnp.asarray(params["bt1"]).reshape(Ht, 1).astype(f32)
    wt2 = jnp.asarray(params["wt2"]).astype(w_dtype)            # (P, Ht)
    bt2 = jnp.asarray(params["bt2"]).reshape(P, 1).astype(f32)
    g2 = jnp.asarray(params["g2"]).reshape(1, D).astype(f32)
    b2 = jnp.asarray(params["b2"]).reshape(1, D).astype(f32)
    wc1 = jnp.asarray(params["wc1"]).T.astype(w_dtype)          # (D, Hc)
    bc1 = jnp.asarray(params["bc1"]).reshape(1, Hc).astype(f32)
    wc2 = jnp.asarray(params["wc2"]).T.astype(w_dtype)          # (Hc, D)
    bc2 = jnp.asarray(params["bc2"]).reshape(1, D).astype(f32)

    vmem_limit = _vmem_limit_bytes()

    # Batch-tile granularity so the 2-D block's second-to-last dim (TB*P) is a
    # multiple of the sublane count (8).
    m = 8 // math.gcd(P, 8)

    if block_batch is not None:
        TB = int(block_batch)
        if (TB * P) % 8 != 0:
            raise ValueError("block_batch * num_patches must be a multiple of 8")
    else:
        row_bytes = max(1, P * D * itemsize)
        tb = max(1, target_tile_bytes // row_bytes)
        tb = min(tb, max_token_unroll, B)
        if B >= 2 * m:
            # keep >=2 grid steps so both v7x TensorCores get work
            tb = min(tb, max(m, B // 2))
        tb = max(m, (tb // m) * m)

        # Shrink if the per-step VMEM estimate (double-buffered I/O tiles +
        # f32 intermediates + resident weights) would blow the scoped budget.
        wdt = jnp.dtype(w_dtype).itemsize
        weight_bytes = ((wt1.size + wt2.size + wc1.size + wc2.size) * wdt
                        + (g1.size + b1.size + g2.size + b2.size
                           + bt1.size + bt2.size + bc1.size + bc2.size) * 4)

        def step_bytes(t):
            rows = t * P
            io = 2 * 2 * rows * D * itemsize        # double-buffered in + out tiles
            inter = rows * (5 * D + Hc) * 4         # x, u, x1, v, c + hidden (f32)
            return io + inter + 2 * weight_bytes

        budget = int(vmem_limit * 0.6)
        while tb > m and step_bytes(tb) > budget:
            tb -= m
        TB = tb

    B_pad = _round_up(B, TB)
    R = TB * P

    # Collapsed lane-dense 2-D view; pad the batch instead of shrinking the tile.
    x2 = x.reshape(B * P, D)
    if B_pad != B:
        x2 = jnp.pad(x2, ((0, (B_pad - B) * P), (0, 0)))

    def resident(arr):
        nd = arr.ndim
        # Whole-array block with a constant index_map -> DMA'd once, VMEM-resident.
        return pl.BlockSpec(arr.shape, lambda i: (0,) * nd)

    grid = (B_pad // TB,)
    out2 = pl.pallas_call(
        _make_mixer_kernel(TB, P),
        out_shape=jax.ShapeDtypeStruct((B_pad * P, D), x.dtype),
        grid_spec=pltpu.PrefetchScalarGridSpec(
            num_scalar_prefetch=0,
            grid=grid,
            in_specs=[
                pl.BlockSpec((R, D), lambda i: (i, 0)),
                resident(g1), resident(b1),
                resident(wt1), resident(bt1),
                resident(wt2), resident(bt2),
                resident(g2), resident(b2),
                resident(wc1), resident(bc1),
                resident(wc2), resident(bc2),
            ],
            out_specs=pl.BlockSpec((R, D), lambda i: (i, 0)),
            scratch_shapes=[pltpu.VMEM((R, D), jnp.float32)],
        ),
        compiler_params=pltpu.CompilerParams(
            dimension_semantics=("parallel",),
            vmem_limit_bytes=vmem_limit,
        ),
    )(x2, g1, b1, wt1, bt1, wt2, bt2, g2, b2, wc1, bc1, wc2, bc2)

    if B_pad != B:
        out2 = out2[: B * P]
    return out2.reshape(B, P, D)


def mixer_block_reference(x, p):
    """Pure-JAX reference, mirroring the PyTorch module structure exactly."""
    # Token mixer: LN -> permute -> Linear(P,Ht) -> gelu -> Linear(Ht,P) -> permute
    u = _layer_norm(x, p["g1"], p["b1"])
    u = jnp.transpose(u, (0, 2, 1))                       # (B, D, P)
    u = u @ p["wt1"].T + p["bt1"]
    u = _gelu(u)
    u = u @ p["wt2"].T + p["bt2"]
    u = jnp.transpose(u, (0, 2, 1))                       # (B, P, D)
    x1 = x + u
    # Channel mixer: LN -> Linear(D,Hc) -> gelu -> Linear(Hc,D)
    v = _layer_norm(x1, p["g2"], p["b2"])
    v = v @ p["wc1"].T + p["bc1"]
    v = _gelu(v)
    v = v @ p["wc2"].T + p["bc2"]
    return x1 + v


def _make_params(key, P, D, Ht, Hc):
    ks = jax.random.split(key, 12)
    scale = 0.02
    return {
        "g1": 1.0 + 0.1 * jax.random.normal(ks[0], (D,), jnp.float32),
        "b1": 0.1 * jax.random.normal(ks[1], (D,), jnp.float32),
        "wt1": scale * jax.random.normal(ks[2], (Ht, P), jnp.float32),
        "bt1": scale * jax.random.normal(ks[3], (Ht,), jnp.float32),
        "wt2": scale * jax.random.normal(ks[4], (P, Ht), jnp.float32),
        "bt2": scale * jax.random.normal(ks[5], (P,), jnp.float32),
        "g2": 1.0 + 0.1 * jax.random.normal(ks[6], (D,), jnp.float32),
        "b2": 0.1 * jax.random.normal(ks[7], (D,), jnp.float32),
        "wc1": scale * jax.random.normal(ks[8], (Hc, D), jnp.float32),
        "bc1": scale * jax.random.normal(ks[9], (Hc,), jnp.float32),
        "wc2": scale * jax.random.normal(ks[10], (D, Hc), jnp.float32),
        "bc2": scale * jax.random.normal(ks[11], (D,), jnp.float32),
    }


if __name__ == "__main__":
    key = jax.random.PRNGKey(0)
    k_x, k_p, k_x2 = jax.random.split(key, 3)

    # Small shapes consistent with the module.
    B, P, D = 2, 8, 32       # batch_size, num_patches, embed_dim
    Ht, Hc = 16, 64          # token_hidden_channels, embed_hidden_channels

    params = _make_params(k_p, P, D, Ht, Hc)
    x = jax.random.normal(k_x, (B, P, D), dtype=jnp.float32)

    out = jax.block_until_ready(mlp_mixer_block1d(x, params))
    ref = mixer_block_reference(x, params)
    assert out.shape == (B, P, D)
    # Tolerance covers MXU default-precision f32 matmuls on both paths.
    assert jnp.allclose(out, ref, atol=1e-2, rtol=1e-2), \
        f"max abs diff {float(jnp.max(jnp.abs(out - ref)))}"

    # Second config: non-divisible batch + explicit tile -> exercises padding
    # and the multi-item unrolled token loop.
    B2 = 5
    x2 = jax.random.normal(k_x2, (B2, P, D), dtype=jnp.float32)
    out2 = jax.block_until_ready(mlp_mixer_block1d(x2, params, block_batch=2))
    ref2 = mixer_block_reference(x2, params)
    assert out2.shape == (B2, P, D)
    assert jnp.allclose(out2, ref2, atol=1e-2, rtol=1e-2), \
        f"max abs diff {float(jnp.max(jnp.abs(out2 - ref2)))}"

    print("KERNEL_OK")
</pallas_src>

<mosaic_0001>
module attributes {stable_mosaic.version = 11 : i64} {
  func.func @kernel(%arg0: i32, %arg1: memref<8x32xf32, #tpu.memory_space<vmem>>, %arg2: memref<1x32xf32, #tpu.memory_space<vmem>>, %arg3: memref<1x32xf32, #tpu.memory_space<vmem>>, %arg4: memref<16x8xf32, #tpu.memory_space<vmem>>, %arg5: memref<16x1xf32, #tpu.memory_space<vmem>>, %arg6: memref<8x16xf32, #tpu.memory_space<vmem>>, %arg7: memref<8x1xf32, #tpu.memory_space<vmem>>, %arg8: memref<1x32xf32, #tpu.memory_space<vmem>>, %arg9: memref<1x32xf32, #tpu.memory_space<vmem>>, %arg10: memref<32x64xf32, #tpu.memory_space<vmem>>, %arg11: memref<1x64xf32, #tpu.memory_space<vmem>>, %arg12: memref<64x32xf32, #tpu.memory_space<vmem>>, %arg13: memref<1x32xf32, #tpu.memory_space<vmem>>, %arg14: memref<8x32xf32, #tpu.memory_space<vmem>>, %arg15: memref<8x32xf32, #tpu.memory_space<vmem>>) attributes {dimension_semantics = [#tpu.dimension_semantics<parallel>], iteration_bounds = array<i64: 2>, scalar_prefetch = 0 : i64, scratch_operands = 1 : i64, tpu.core_type = #tpu.core_type<tc>, window_params = [{transform_indices = @transform_0, window_bounds = array<i64: 8, 32>}, {pipeline_mode = #tpu.pipeline_mode<synchronous>, transform_indices = @transform_1, window_bounds = array<i64: 1, 32>}, {pipeline_mode = #tpu.pipeline_mode<synchronous>, transform_indices = @transform_2, window_bounds = array<i64: 1, 32>}, {pipeline_mode = #tpu.pipeline_mode<synchronous>, transform_indices = @transform_3, window_bounds = array<i64: 16, 8>}, {pipeline_mode = #tpu.pipeline_mode<synchronous>, transform_indices = @transform_4, window_bounds = array<i64: 16, 1>}, {pipeline_mode = #tpu.pipeline_mode<synchronous>, transform_indices = @transform_5, window_bounds = array<i64: 8, 16>}, {pipeline_mode = #tpu.pipeline_mode<synchronous>, transform_indices = @transform_6, window_bounds = array<i64: 8, 1>}, {pipeline_mode = #tpu.pipeline_mode<synchronous>, transform_indices = @transform_7, window_bounds = array<i64: 1, 32>}, {pipeline_mode = #tpu.pipeline_mode<synchronous>, transform_indices = @transform_8, window_bounds = array<i64: 1, 32>}, {pipeline_mode = #tpu.pipeline_mode<synchronous>, transform_indices = @transform_9, window_bounds = array<i64: 32, 64>}, {pipeline_mode = #tpu.pipeline_mode<synchronous>, transform_indices = @transform_10, window_bounds = array<i64: 1, 64>}, {pipeline_mode = #tpu.pipeline_mode<synchronous>, transform_indices = @transform_11, window_bounds = array<i64: 64, 32>}, {pipeline_mode = #tpu.pipeline_mode<synchronous>, transform_indices = @transform_12, window_bounds = array<i64: 1, 32>}, {transform_indices = @transform_13, window_bounds = array<i64: 8, 32>}]} {
    %c0 = arith.constant 0 : index
    %c0_0 = arith.constant 0 : index
    %0 = vector.load %arg1[%c0, %c0_0] : memref<8x32xf32, #tpu.memory_space<vmem>>, vector<8x32xf32>
    %c0_1 = arith.constant 0 : index
    %c0_2 = arith.constant 0 : index
    %1 = vector.load %arg2[%c0_1, %c0_2] : memref<1x32xf32, #tpu.memory_space<vmem>>, vector<1x32xf32>
    %c0_3 = arith.constant 0 : index
    %c0_4 = arith.constant 0 : index
    %2 = vector.load %arg3[%c0_3, %c0_4] : memref<1x32xf32, #tpu.memory_space<vmem>>, vector<1x32xf32>
    %cst = arith.constant dense<0.000000e+00> : vector<8xf32>
    %3 = vector.multi_reduction <add>, %0, %cst [1] : vector<8x32xf32> to vector<8xf32>
    %4 = vector.shape_cast %3 : vector<8xf32> to vector<8x1xf32>
    %cst_5 = arith.constant 3.200000e+01 : f32
    %5 = vector.broadcast %cst_5 : f32 to vector<8x1xf32>
    %6 = arith.divf %4, %5 : vector<8x1xf32>
    %7 = vector.broadcast %6 : vector<8x1xf32> to vector<8x32xf32>
    %8 = arith.subf %0, %7 : vector<8x32xf32>
    %9 = arith.mulf %8, %8 : vector<8x32xf32>
    %cst_6 = arith.constant dense<0.000000e+00> : vector<8xf32>
    %10 = vector.multi_reduction <add>, %9, %cst_6 [1] : vector<8x32xf32> to vector<8xf32>
    %11 = vector.shape_cast %10 : vector<8xf32> to vector<8x1xf32>
    %cst_7 = arith.constant 3.200000e+01 : f32
    %12 = vector.broadcast %cst_7 : f32 to vector<8x1xf32>
    %13 = arith.divf %11, %12 : vector<8x1xf32>
    %cst_8 = arith.constant 9.99999996E-13 : f32
    %14 = vector.broadcast %cst_8 : f32 to vector<8x1xf32>
    %15 = arith.addf %13, %14 : vector<8x1xf32>
    %16 = math.rsqrt %15 : vector<8x1xf32>
    %17 = vector.broadcast %16 : vector<8x1xf32> to vector<8x32xf32>
    %18 = arith.mulf %8, %17 : vector<8x32xf32>
    %19 = vector.broadcast %1 : vector<1x32xf32> to vector<8x32xf32>
    %20 = arith.mulf %18, %19 : vector<8x32xf32>
    %21 = vector.broadcast %2 : vector<1x32xf32> to vector<8x32xf32>
    %22 = arith.addf %20, %21 : vector<8x32xf32>
    %c0_9 = arith.constant 0 : index
    %c0_10 = arith.constant 0 : index
    %23 = vector.load %arg4[%c0_9, %c0_10] : memref<16x8xf32, #tpu.memory_space<vmem>>, vector<16x8xf32>
    %c0_11 = arith.constant 0 : index
    %c0_12 = arith.constant 0 : index
    %24 = vector.load %arg6[%c0_11, %c0_12] : memref<8x16xf32, #tpu.memory_space<vmem>>, vector<8x16xf32>
    %c0_13 = arith.constant 0 : index
    %c0_14 = arith.constant 0 : index
    %25 = vector.load %arg5[%c0_13, %c0_14] : memref<16x1xf32, #tpu.memory_space<vmem>>, vector<16x1xf32>
    %c0_15 = arith.constant 0 : index
    %c0_16 = arith.constant 0 : index
    %26 = vector.load %arg7[%c0_15, %c0_16] : memref<8x1xf32, #tpu.memory_space<vmem>>, vector<8x1xf32>
    %cst_17 = arith.constant dense<0.000000e+00> : vector<16x32xf32>
    %27 = tpu.matmul %23, %22, %cst_17 {dimension_numbers = #tpu.dot_dimension_numbers<[1], [0], [0], [1], [0, 0, 1, 1], [], []>} : vector<16x8xf32>, vector<8x32xf32>, vector<16x32xf32> -> vector<16x32xf32>
    %28 = vector.broadcast %25 : vector<16x1xf32> to vector<16x32xf32>
    %29 = arith.addf %27, %28 : vector<16x32xf32>
    %30 = arith.mulf %29, %29 : vector<16x32xf32>
    %31 = arith.mulf %29, %30 : vector<16x32xf32>
    %cst_18 = arith.constant 4.471500e-02 : f32
    %32 = vector.broadcast %cst_18 : f32 to vector<16x32xf32>
    %33 = arith.mulf %32, %31 : vector<16x32xf32>
    %34 = arith.addf %29, %33 : vector<16x32xf32>
    %cst_19 = arith.constant 0.797884583 : f32
    %35 = vector.broadcast %cst_19 : f32 to vector<16x32xf32>
    %36 = arith.mulf %35, %34 : vector<16x32xf32>
    %37 = math.tanh %36 : vector<16x32xf32>
    %cst_20 = arith.constant 1.000000e+00 : f32
    %38 = vector.broadcast %cst_20 : f32 to vector<16x32xf32>
    %39 = arith.addf %38, %37 : vector<16x32xf32>
    %cst_21 = arith.constant 5.000000e-01 : f32
    %40 = vector.broadcast %cst_21 : f32 to vector<16x32xf32>
    %41 = arith.mulf %40, %39 : vector<16x32xf32>
    %42 = arith.mulf %29, %41 : vector<16x32xf32>
    %cst_22 = arith.constant dense<0.000000e+00> : vector<8x32xf32>
    %43 = tpu.matmul %24, %42, %cst_22 {dimension_numbers = #tpu.dot_dimension_numbers<[1], [0], [0], [1], [0, 0, 1, 1], [], []>} : vector<8x16xf32>, vector<16x32xf32>, vector<8x32xf32> -> vector<8x32xf32>
    %44 = vector.broadcast %26 : vector<8x1xf32> to vector<8x32xf32>
    %45 = arith.addf %43, %44 : vector<8x32xf32>
    %46 = arith.addf %0, %45 : vector<8x32xf32>
    %c0_23 = arith.constant 0 : index
    %c0_24 = arith.constant 0 : index
    %47 = vector.load %arg15[%c0_23, %c0_24] : memref<8x32xf32, #tpu.memory_space<vmem>>, vector<8x32xf32>
    tpu.vector_store %arg15[%c0_23, %c0_24], %46 {strides = array<i32>} : memref<8x32xf32, #tpu.memory_space<vmem>>, vector<8x32xf32>,
    %c0_25 = arith.constant 0 : index
    %c0_26 = arith.constant 0 : index
    %48 = vector.load %arg15[%c0_25, %c0_26] : memref<8x32xf32, #tpu.memory_space<vmem>>, vector<8x32xf32>
    %c0_27 = arith.constant 0 : index
    %c0_28 = arith.constant 0 : index
    %49 = vector.load %arg8[%c0_27, %c0_28] : memref<1x32xf32, #tpu.memory_space<vmem>>, vector<1x32xf32>
    %c0_29 = arith.constant 0 : index
    %c0_30 = arith.constant 0 : index
    %50 = vector.load %arg9[%c0_29, %c0_30] : memref<1x32xf32, #tpu.memory_space<vmem>>, vector<1x32xf32>
    %cst_31 = arith.constant dense<0.000000e+00> : vector<8xf32>
    %51 = vector.multi_reduction <add>, %48, %cst_31 [1] : vector<8x32xf32> to vector<8xf32>
    %52 = vector.shape_cast %51 : vector<8xf32> to vector<8x1xf32>
    %cst_32 = arith.constant 3.200000e+01 : f32
    %53 = vector.broadcast %cst_32 : f32 to vector<8x1xf32>
    %54 = arith.divf %52, %53 : vector<8x1xf32>
    %55 = vector.broadcast %54 : vector<8x1xf32> to vector<8x32xf32>
    %56 = arith.subf %48, %55 : vector<8x32xf32>
    %57 = arith.mulf %56, %56 : vector<8x32xf32>
    %cst_33 = arith.constant dense<0.000000e+00> : vector<8xf32>
    %58 = vector.multi_reduction <add>, %57, %cst_33 [1] : vector<8x32xf32> to vector<8xf32>
    %59 = vector.shape_cast %58 : vector<8xf32> to vector<8x1xf32>
    %cst_34 = arith.constant 3.200000e+01 : f32
    %60 = vector.broadcast %cst_34 : f32 to vector<8x1xf32>
    %61 = arith.divf %59, %60 : vector<8x1xf32>
    %cst_35 = arith.constant 9.99999996E-13 : f32
    %62 = vector.broadcast %cst_35 : f32 to vector<8x1xf32>
    %63 = arith.addf %61, %62 : vector<8x1xf32>
    %64 = math.rsqrt %63 : vector<8x1xf32>
    %65 = vector.broadcast %64 : vector<8x1xf32> to vector<8x32xf32>
    %66 = arith.mulf %56, %65 : vector<8x32xf32>
    %67 = vector.broadcast %49 : vector<1x32xf32> to vector<8x32xf32>
    %68 = arith.mulf %66, %67 : vector<8x32xf32>
    %69 = vector.broadcast %50 : vector<1x32xf32> to vector<8x32xf32>
    %70 = arith.addf %68, %69 : vector<8x32xf32>
    %c0_36 = arith.constant 0 : index
    %c0_37 = arith.constant 0 : index
    %71 = vector.load %arg10[%c0_36, %c0_37] : memref<32x64xf32, #tpu.memory_space<vmem>>, vector<32x64xf32>
    %cst_38 = arith.constant dense<0.000000e+00> : vector<8x64xf32>
    %72 = tpu.matmul %70, %71, %cst_38 {dimension_numbers = #tpu.dot_dimension_numbers<[1], [0], [0], [1], [0, 0, 1, 1], [], []>} : vector<8x32xf32>, vector<32x64xf32>, vector<8x64xf32> -> vector<8x64xf32>
    %c0_39 = arith.constant 0 : index
    %c0_40 = arith.constant 0 : index
    %73 = vector.load %arg11[%c0_39, %c0_40] : memref<1x64xf32, #tpu.memory_space<vmem>>, vector<1x64xf32>
    %74 = vector.broadcast %73 : vector<1x64xf32> to vector<8x64xf32>
    %75 = arith.addf %72, %74 : vector<8x64xf32>
    %76 = arith.mulf %75, %75 : vector<8x64xf32>
    %77 = arith.mulf %75, %76 : vector<8x64xf32>
    %cst_41 = arith.constant 4.471500e-02 : f32
    %78 = vector.broadcast %cst_41 : f32 to vector<8x64xf32>
    %79 = arith.mulf %78, %77 : vector<8x64xf32>
    %80 = arith.addf %75, %79 : vector<8x64xf32>
    %cst_42 = arith.constant 0.797884583 : f32
    %81 = vector.broadcast %cst_42 : f32 to vector<8x64xf32>
    %82 = arith.mulf %81, %80 : vector<8x64xf32>
    %83 = math.tanh %82 : vector<8x64xf32>
    %cst_43 = arith.constant 1.000000e+00 : f32
    %84 = vector.broadcast %cst_43 : f32 to vector<8x64xf32>
    %85 = arith.addf %84, %83 : vector<8x64xf32>
    %cst_44 = arith.constant 5.000000e-01 : f32
    %86 = vector.broadcast %cst_44 : f32 to vector<8x64xf32>
    %87 = arith.mulf %86, %85 : vector<8x64xf32>
    %88 = arith.mulf %75, %87 : vector<8x64xf32>
    %c0_45 = arith.constant 0 : index
    %c0_46 = arith.constant 0 : index
    %89 = vector.load %arg12[%c0_45, %c0_46] : memref<64x32xf32, #tpu.memory_space<vmem>>, vector<64x32xf32>
    %cst_47 = arith.constant dense<0.000000e+00> : vector<8x32xf32>
    %90 = tpu.matmul %88, %89, %cst_47 {dimension_numbers = #tpu.dot_dimension_numbers<[1], [0], [0], [1], [0, 0, 1, 1], [], []>} : vector<8x64xf32>, vector<64x32xf32>, vector<8x32xf32> -> vector<8x32xf32>
    %c0_48 = arith.constant 0 : index
    %c0_49 = arith.constant 0 : index
    %91 = vector.load %arg13[%c0_48, %c0_49] : memref<1x32xf32, #tpu.memory_space<vmem>>, vector<1x32xf32>
    %92 = vector.broadcast %91 : vector<1x32xf32> to vector<8x32xf32>
    %93 = arith.addf %90, %92 : vector<8x32xf32>
    %94 = arith.addf %48, %93 : vector<8x32xf32>
    %c0_50 = arith.constant 0 : index
    %c0_51 = arith.constant 0 : index
    %95 = vector.load %arg14[%c0_50, %c0_51] : memref<8x32xf32, #tpu.memory_space<vmem>>, vector<8x32xf32>
    tpu.vector_store %arg14[%c0_50, %c0_51], %94 {strides = array<i32>} : memref<8x32xf32, #tpu.memory_space<vmem>>, vector<8x32xf32>,
    return
  }
  func.func @transform_0(%arg0: i32) -> (i32, i32) {
    %c0_i32 = arith.constant 0 : i32
    %c0_i32_0 = arith.constant 0 : i32
    return %arg0, %c0_i32 : i32, i32
  }
  func.func @transform_1(%arg0: i32) -> (i32, i32) {
    %c0_i32 = arith.constant 0 : i32
    %c0_i32_0 = arith.constant 0 : i32
    %c0_i32_1 = arith.constant 0 : i32
    return %c0_i32, %c0_i32_0 : i32, i32
  }
  func.func @transform_2(%arg0: i32) -> (i32, i32) {
    %c0_i32 = arith.constant 0 : i32
    %c0_i32_0 = arith.constant 0 : i32
    %c0_i32_1 = arith.constant 0 : i32
    return %c0_i32, %c0_i32_0 : i32, i32
  }
  func.func @transform_3(%arg0: i32) -> (i32, i32) {
    %c0_i32 = arith.constant 0 : i32
    %c0_i32_0 = arith.constant 0 : i32
    %c0_i32_1 = arith.constant 0 : i32
    return %c0_i32, %c0_i32_0 : i32, i32
  }
  func.func @transform_4(%arg0: i32) -> (i32, i32) {
    %c0_i32 = arith.constant 0 : i32
    %c0_i32_0 = arith.constant 0 : i32
    %c0_i32_1 = arith.constant 0 : i32
    return %c0_i32, %c0_i32_0 : i32, i32
  }
  func.func @transform_5(%arg0: i32) -> (i32, i32) {
    %c0_i32 = arith.constant 0 : i32
    %c0_i32_0 = arith.constant 0 : i32
    %c0_i32_1 = arith.constant 0 : i32
    return %c0_i32, %c0_i32_0 : i32, i32
  }
  func.func @transform_6(%arg0: i32) -> (i32, i32) {
    %c0_i32 = arith.constant 0 : i32
    %c0_i32_0 = arith.constant 0 : i32
    %c0_i32_1 = arith.constant 0 : i32
    return %c0_i32, %c0_i32_0 : i32, i32
  }
  func.func @transform_7(%arg0: i32) -> (i32, i32) {
    %c0_i32 = arith.constant 0 : i32
    %c0_i32_0 = arith.constant 0 : i32
    %c0_i32_1 = arith.constant 0 : i32
    return %c0_i32, %c0_i32_0 : i32, i32
  }
  func.func @transform_8(%arg0: i32) -> (i32, i32) {
    %c0_i32 = arith.constant 0 : i32
    %c0_i32_0 = arith.constant 0 : i32
    %c0_i32_1 = arith.constant 0 : i32
    return %c0_i32, %c0_i32_0 : i32, i32
  }
  func.func @transform_9(%arg0: i32) -> (i32, i32) {
    %c0_i32 = arith.constant 0 : i32
    %c0_i32_0 = arith.constant 0 : i32
    %c0_i32_1 = arith.constant 0 : i32
    return %c0_i32, %c0_i32_0 : i32, i32
  }
  func.func @transform_10(%arg0: i32) -> (i32, i32) {
    %c0_i32 = arith.constant 0 : i32
    %c0_i32_0 = arith.constant 0 : i32
    %c0_i32_1 = arith.constant 0 : i32
    return %c0_i32, %c0_i32_0 : i32, i32
  }
  func.func @transform_11(%arg0: i32) -> (i32, i32) {
    %c0_i32 = arith.constant 0 : i32
    %c0_i32_0 = arith.constant 0 : i32
    %c0_i32_1 = arith.constant 0 : i32
    return %c0_i32, %c0_i32_0 : i32, i32
  }
  func.func @transform_12(%arg0: i32) -> (i32, i32) {
    %c0_i32 = arith.constant 0 : i32
    %c0_i32_0 = arith.constant 0 : i32
    %c0_i32_1 = arith.constant 0 : i32
    return %c0_i32, %c0_i32_0 : i32, i32
  }
  func.func @transform_13(%arg0: i32) -> (i32, i32) {
    %c0_i32 = arith.constant 0 : i32
    %c0_i32_0 = arith.constant 0 : i32
    return %arg0, %c0_i32 : i32, i32
  }
}

</mosaic_0001>

<bundles_post_ra>
// kernel: tpu_custom_call.1
= control target key start
LH: loop header
LB: loop body
LE: loop exit
PB: predicated region body
PF: predicated region fallthrough
CT: control target
= control target key end

     0   :  { %s1151_s0 = inlined_call_operand.vmem [shape: f32[16,32], index: 0, kind: input, shape index: {}]   ;;  %s1152_s1 = inlined_call_operand.vmem [shape: f32[1,32], index: 1, kind: input, shape index: {}]   ;;  %s1153_s2 = inlined_call_operand.vmem [shape: f32[1,32], index: 2, kind: input, shape index: {}]   ;;  %s1154_s3 = inlined_call_operand.vmem [shape: f32[16,8], index: 3, kind: input, shape index: {}]   ;;  %s1155_s4 = inlined_call_operand.vmem [shape: f32[16,1], index: 4, kind: input, shape index: {}]   ;;  %s1156_s5 = inlined_call_operand.vmem [shape: f32[8,16], index: 5, kind: input, shape index: {}]   ;;  %s1157_s6 = inlined_call_operand.vmem [shape: f32[8,1], index: 6, kind: input, shape index: {}]   ;;  %s1158_s7 = inlined_call_operand.vmem [shape: f32[1,32], index: 7, kind: input, shape index: {}]   ;;  %s1159_s8 = inlined_call_operand.vmem [shape: f32[1,32], index: 8, kind: input, shape index: {}]   ;;  %s1160_s9 = inlined_call_operand.vmem [shape: f32[32,64], index: 9, kind: input, shape index: {}]   ;;  %s1161_s10 = inlined_call_operand.vmem [shape: f32[1,64], index: 10, kind: input, shape index: {}]   ;;  %s1162_s11 = inlined_call_operand.vmem [shape: f32[64,32], index: 11, kind: input, shape index: {}]   ;;  %s1163_s12 = inlined_call_operand.vmem [shape: f32[1,32], index: 12, kind: input, shape index: {}]   ;;  %s1164_s13 = inlined_call_operand.hbm [shape: f32[16,32], index: 13, kind: output, shape index: {}]  }
   0x1   :  { %1165 = sst [smem:[#allocation6_spill]] %s1151_s0 }
   0x2   :  { %1166 = sst [smem:[#allocation7_spill]] %s1152_s1 }
   0x3   :  { %1167 = sst [smem:[#allocation8_spill]] %s1153_s2 }
   0x4   :  { %1168 = sst [smem:[#allocation9_spill]] %s1154_s3 }
   0x5   :  { %18 = vsyncpa [#allocation4], 0 }
   0x6   :  { %20 = vsyncpa [#allocation4 + $0x1], 0  ;;  %s971_s25 = smov 0   ;;  %s973_s26 = smov 0  }
   0x7   :  { %s975_s27 = smov 0   ;;  %s977_s28 = smov 0  }
   0x8 LB: > { %s992_s29 = sadd.s32 4294967295, %s897_s28   ;;  %s758_s30 = sadd.s32 4294967294, %s897_s28   ;;  %s897_s28 = sphi %s977_s28, %s1178_s28   ;;  %s893_s27 = sphi %s975_s27, %s1177_s27   ;;  %s889_s26 = sphi %s973_s26, %s1176_s26   ;;  %s885_s25 = sphi %s971_s25, %s1175_s25  }
   0x9   : > { %s996_s14 = sadd.s32 1, %s897_s28   ;;  %s311_s15 = sadd.s32 1, %s893_s27 }
   0xa   : > { %s308_s16 = ssub.s32 %s897_s28, %s996_s14  ;;  %p321_p0 = scmp.ne.s32.totalorder %s893_s27, %s889_s26 }
   0xb   : > { %p309_p1 = scmp.eq.s32.totalorder %s308_s16, 0  ;;  %p322_p2 = scmp.eq.s32.totalorder %s992_s29, 1 }
   0xc   : > { %p327_p3 = scmp.ne.s32.totalorder %s889_s26, %s885_s25  ;;  %p328_p4 = scmp.eq.s32.totalorder %s758_s30, 1 }
   0xd   : > { %s1007_s17 = scalar_select %p309_p1, %s893_s27, %s311_s15  }
   0xe   : > { %p1009_p5 = por %p322_p2, %p321_p0  ;;  %p1013_p6 = por %p328_p4, %p327_p3 }
   0xf   : > { %p761_p7 = scmp.ge.s32.totalorder %s897_s28, 1  ;;  %p389_p8 = scmp.lt.s32.totalorder %s897_s28, 3 }
  0x11   : > { %p390_p9 = pnand %p761_p7, %p389_p8 }
  0x12   : > { %p432_p10 = scmp.lt.s32.totalorder (!%p390_p9), %s992_s29, 1  ;;  %s1171_s0 = sld [smem:[#allocation6_spill]] (!%p390_p9) }
  0x13   : > { %393 = sbr.rel (%p390_p9) target bundleno = 1162 (0x48a), region = 72  ;;  %s1172_s1 = sld [smem:[#allocation7_spill]] (!%p390_p9) }
  0x14   : > { %s1173_s2 = sld [smem:[#allocation8_spill]] (!%p390_p9) }
  0x15   : > { %s1174_s3 = sld [smem:[#allocation9_spill]] (!%p390_p9) }
  0x18   : > { %s433_s20 = scalar_select %p432_p10, %s992_s29, 1  ;;  %vm439_vm0 = vcmask 261120   ;;  %v899_v2 = vmov 32.0   ;;  %v481_v14 = vld [vmem:[%s1155_s4 + $0x8] sm:$0xff]  ;;  %v900_v15 = vmov 0   ;;  %v480_v19 = vld [vmem:[%s1155_s4] sm:$0xff] }
  0x19   : > { %823 = vrcp.f32 %v899_v2  ;;  %814 = vset.pattern.permute.xlu1 %v900_v15  ;;  %815 = vset.pattern.permute.xlu2 %v900_v15  ;;  %v817_v26 = vld [vmem:[%s1172_s1] ss:$0 sm:$0xff]  ;;  %vm493_vm5 = vcmask 64512   ;;  %vm546_vm6 = vcmask 130048   ;;  %vm657_vm10 = vcmask 523264   ;;  %s429_s1 = sand.u32 1, %s889_s26  }
  0x1a   : > { %s763_s21 = sshll.u32 %s433_s20, 3  ;;  %490 = vperm.xlu1 %814, %v481_v14   ;;  %816 = vset.pattern.permute.xlu0 %v900_v15  ;;  %v818_v29 = vld [vmem:[%s1173_s2] ss:$0 sm:$0xff]  ;;  %s762_s20 = sshll.u32 %s429_s1, 3 }
  0x1b   : > { %s435_s24 = scalar_lea.vmem %s1171_s0, %s763_s21  ;;  %v477_v32 = vld [vmem:[%s1174_s3] sm:$0xff]  ;;  %v478_v33 = vld [vmem:[%s1174_s3 + $0x8] sm:$0xff]  ;;  %s770_s21 = sshll.u32 %s992_s29, 3 }
  0x1c   : > { %v1024_v0 = vld [vmem:[%s435_s24] sm:$0xff]  ;;  %s694_s15 = scalar_lea.hbm %s1164_s13, %s770_s21  ;;  %s431_s16 = scalar_lea.vmem [#allocation3], %s762_s20 }
  0x1d   : > { %v440_v1 = vsel %vm439_vm0, %v1024_v0, 0.0  ;;  %v482_v40 = vld [vmem:[%s1157_s6] sm:$0xff]  ;;  %s696_s0 = sshll.u32 %s431_s16, 4  ;;  %s698_s2 = sshll.u32 %s694_s15, 4  ;;  %s697_s0 = int_to_ptr.vmem [resolvable:$true] %s696_s0  ;;  %s699_s2 = int_to_ptr.hbm [resolvable:$true] %s698_s2 }
  0x1e   : > { %441 = vadd.xlane.f32.xlu0 %v440_v1  ;;  %543 = vperm.xlu2 %815, %v482_v40   ;;  %v479_v59 = vld [vmem:[%s1156_s5] sm:$0xff]  ;;  %s684_s29 = scalar_lea.sflag [#allocation4], %s429_s1  ;;  %s849_s3 = sshra.s32 %s699_s2, 4  ;;  %s850_s3 = int_to_ptr.hbm [resolvable:$true] %s849_s3 }
  0x1f   : > { %v824_v3 = vpop.eup %823  ;;  %s851_s22 = scalar_lea.hbm %s850_s3, 8  ;;  %s855_s20 = scalar_lea.hbm %s1164_s13, 16 }
  0x20   : > { %v444_v4 = vmul.f32 32.0, %v824_v3  ;;  %vm448_vm1 = vweird.f32 %v824_v3  ;;  %p852_p11 = scmp.ne.s32.totalorder %s850_s3, %s851_s22  ;;  %p856_p0 = scmp.lt.s32.totalorder %s850_s3, %s1164_s13 }
  0x21   : > { %p857_p1 = scmp.lt.s32.totalorder %s855_s20, %s851_s22 }
  0x22   : > { %v445_v5 = vsub.f32 1.0, %v444_v4  ;;  %485 = vperm.xlu1 %814, %v480_v19   ;;  %p853_p12 = pnand %p852_p11, %p1009_p5 }
  0x23   : > { %p858_p2 = por %p857_p1, %p856_p0 }
  0x24   : > { %v446_v6 = vmul.f32 %v824_v3, %v445_v5  ;;  %p854_p13 = pneg %p853_p12 }
  0x26   : > { %v447_v7 = vadd.f32 %v824_v3, %v446_v6  ;;  %p859_p3 = pnand %p858_p2, %p854_p13 }
  0x28   : > { %v1028_v8 = vsel %vm448_vm1, %v824_v3, %v447_v7 }
  0x78   : > { %v544_v60 = vpop.permute.xlu2 %543 }
  0x8c   : > { %v491_v34 = vpop.permute.xlu1 %490 }
  0x91   : > { %v442_v9 = vpop.xlane.xlu0 %441 }
  0x92   : > { %v450_v10 = vmul.f32 %v1028_v8, %v442_v9  ;;  %v607_v9 = vld [vmem:[%s1160_s9 + $0x10] sm:$0xff] }
  0x94   : > { %v451_v11 = vsub.f32 %v1024_v0, %v450_v10  ;;  %v486_v35 = vpop.permute.xlu1 %485  ;;  %v606_v10 = vld [vmem:[%s1160_s9 + $0x8] sm:$0xff] }
  0x96   : > { %v452_v12 = vmul.f32 %v451_v11, %v451_v11 }
  0x98   : > { %v453_v13 = vsel %vm439_vm0, %v452_v12, 0.0 }
  0x99   : > { %454 = vadd.xlane.f32.xlu0 %v453_v13 }
 0x10c   : > { %v455_v16 = vpop.xlane.xlu0 %454 }
 0x10d   : > { %v456_v17 = vmul.f32 %v455_v16, %v1028_v8 }
 0x10f   : > { %v457_v18 = vadd.f32 1e-12, %v456_v17 }
 0x111   : > { %825 = vrsqrt.f32 %v457_v18  ;;  %vm464_vm3 = vweird.f32 %v457_v18 }
 0x117   : > { %v826_v20 = vpop.eup %825 }
 0x118   : > { %v459_v21 = vmul.f32 %v826_v20, %v457_v18  ;;  %vm465_vm2 = vweird.f32 %v826_v20 }
 0x119   : > { %vm466_vm4 = vmor %vm464_vm3, %vm465_vm2 }
 0x11a   : > { %v460_v22 = vmul.f32 %v826_v20, %v459_v21  ;;  %v819_v21 = vld [vmem:[%s1158_s7] ss:$0 sm:$0xff] }
 0x11c   : > { %v461_v23 = vmul.f32 0.5, %v460_v22 }
 0x11e   : > { %v462_v24 = vsub.f32 1.5, %v461_v23 }
 0x120   : > { %v463_v25 = vmul.f32 %v826_v20, %v462_v24 }
 0x122   : > { %v467_v27 = vsel %vm466_vm4, %v826_v20, %v463_v25 }
 0x123   : > { %v468_v28 = vmul.f32 %v467_v27, %v451_v11  ;;  %v605_v11 = vld [vmem:[%s1160_s9] sm:$0xff]  ;;  %v651_v27 = vld [vmem:[%s1162_s11 + $0x30] sm:$0xff] }
 0x125   : > { %v472_v30 = vmul.f32 %v817_v26, %v468_v28  ;;  %v652_v26 = vld [vmem:[%s1162_s11 + $0x38] sm:$0xff]  ;;  %v650_v28 = vld [vmem:[%s1162_s11 + $0x28] sm:$0xff] }
 0x126   : > { %669 = vmatpush.msra.mxu3 %v652_v26 }
 0x127   : > { %v476_v31 = vadd.f32 %v818_v29, %v472_v30  ;;  %v649_v29 = vld [vmem:[%s1162_s11 + $0x20] sm:$0xff]  ;;  %v648_v30 = vld [vmem:[%s1162_s11 + $0x18] sm:$0xff] }
 0x128   : > { %670 = vmatpush.msra.mxu3 %v651_v27 }
 0x129   : > { %515 = vmatpush.msra.mxu0 %v476_v31  ;;  %v647_v31 = vld [vmem:[%s1162_s11 + $0x10] sm:$0xff] }
 0x12a   : > { %764 = vmatmul.msk.f32.vlgmr.msra.gmra.mxu0 %vm493_vm5, %v477_v32  ;;  %671 = vmatpush.msra.mxu3 %v650_v28  ;;  %v646_v32 = vld [vmem:[%s1162_s11 + $0x8] sm:$0xff] }
 0x12c   : > { %672 = vmatpush.msra.mxu3 %v649_v29 }
 0x12e   : > { %673 = vmatpush.msra.mxu3 %v648_v30 }
 0x130   : > { %674 = vmatpush.msra.mxu3 %v647_v31 }
 0x132   : > { %765 = vmatmul.msk.f32.gmra.mxu0 %vm493_vm5, %v478_v33  ;;  %v645_v33 = vld [vmem:[%s1162_s11] sm:$0xff]  ;;  %675 = vmatpush.msra.mxu3 %v646_v32 }
 0x134   : > { %676 = vmatpush.msra.mxu3 %v645_v33 }
 0x1a7   : > { %v517_v36 = vpop.f32.mrf.mxu0 }
 0x1a8   : > { %v518_v37 = vadd.f32 %v517_v36, %v486_v35 }
 0x1aa   : > { %v523_v38 = vmul.f32 %v518_v37, %v518_v37 }
 0x1ac   : > { %v525_v39 = vmul.f32 %v523_v38, %v518_v37 }
 0x1ae   : > { %v527_v41 = vmul.f32 0.044715, %v525_v39 }
 0x1af   : > { %v520_v42 = vpop.f32.mrf.mxu0 }
 0x1b0   : > { %v521_v43 = vadd.f32 %v520_v42, %v491_v34  ;;  %v529_v44 = vadd.f32 %v527_v41, %v518_v37  ;;  %v821_v34 = vld [vmem:[%s1161_s10] ss:$0 sm:$0xff] }
 0x1b2   : > { %v524_v45 = vmul.f32 %v521_v43, %v521_v43  ;;  %v531_v47 = vmul.f32 0.7978846, %v529_v44 }
 0x1b4   : > { %v526_v46 = vmul.f32 %v524_v45, %v521_v43  ;;  %827 = vtanh.f32 %v531_v47 }
 0x1b6   : > { %v528_v48 = vmul.f32 0.044715, %v526_v46  ;;  %v822_v46 = vld [vmem:[%s1163_s12] ss:$0 sm:$0xff] }
 0x1b8   : > { %v530_v49 = vadd.f32 %v528_v48, %v521_v43 }
 0x1ba   : > { %v532_v50 = vmul.f32 0.7978846, %v530_v49  ;;  %v828_v51 = vpop.eup %827 }
 0x1bb   : > { %v535_v52 = vadd.f32 1.0, %v828_v51 }
 0x1bc   : > { %829 = vtanh.f32 %v532_v50 }
 0x1bd   : > { %v537_v56 = vmul.f32 0.5, %v535_v52 }
 0x1bf   : > { %v539_v58 = vmul.f32 %v537_v56, %v518_v37 }
 0x1c2   : > { %v830_v53 = vpop.eup %829 }
 0x1c3   : > { %v536_v54 = vadd.f32 1.0, %v830_v53 }
 0x1c5   : > { %v538_v55 = vmul.f32 0.5, %v536_v54 }
 0x1c7   : > { %v540_v57 = vmul.f32 %v538_v55, %v521_v43 }
 0x1c9   : > { %564 = vmatpush.msra.mxu1 %v540_v57 }
 0x1cb   : > { %565 = vmatpush.msra.mxu1 %v539_v58 }
 0x1cc   : > { %766 = vmatmul.msk.f32.vlgmr.msra.gmra.mxu1 %vm546_vm6, %v479_v59 }
 0x249   : > { %v567_v61 = vpop.f32.mrf.mxu1 }
 0x24a   : > { %v568_v62 = vadd.f32 %v567_v61, %v544_v60 }
 0x24c   : > { %v570_v63 = vadd.f32 %v568_v62, %v1024_v0  ;;  %v608_v0 = vld [vmem:[%s1160_s9 + $0x18] sm:$0xff] }
 0x24d   : > { %628 = vmatpush.msra.mxu2 %v608_v0 }
 0x24e   : > { %571 = vst.msk [vmem:[#allocation2] sm:$0xff] %vm439_vm0, %v570_v63 }
 0x24f   : > { %629 = vmatpush.msra.mxu2 %v607_v9 }
 0x251   : > { %630 = vmatpush.msra.mxu2 %v606_v10 }
 0x253   : > { %631 = vmatpush.msra.mxu2 %v605_v11 }
 0x255   : > { %v1060_v1 = vld [vmem:[#allocation2] sm:$0xff] }
 0x256   : > { %v575_v2 = vsel %vm439_vm0, %v1060_v1, 0.0 }
 0x257   : > { %576 = vadd.xlane.f32.xlu2 %v575_v2 }
 0x2ca   : > { %v577_v3 = vpop.xlane.xlu2 %576 }
 0x2cb   : > { %v578_v4 = vmul.f32 %v577_v3, %v1028_v8 }
 0x2cd   : > { %v579_v5 = vsub.f32 %v1060_v1, %v578_v4 }
 0x2cf   : > { %v580_v6 = vmul.f32 %v579_v5, %v579_v5 }
 0x2d1   : > { %v581_v7 = vsel %vm439_vm0, %v580_v6, 0.0 }
 0x2d2   : > { %582 = vadd.xlane.f32.xlu0 %v581_v7 }
 0x345   : > { %v583_v12 = vpop.xlane.xlu0 %582 }
 0x346   : > { %v584_v13 = vmul.f32 %v583_v12, %v1028_v8  ;;  %v820_v8 = vld [vmem:[%s1159_s8] ss:$0 sm:$0xff] }
 0x348   : > { %v585_v14 = vadd.f32 1e-12, %v584_v13 }
 0x34a   : > { %831 = vrsqrt.f32 %v585_v14  ;;  %vm592_vm8 = vweird.f32 %v585_v14 }
 0x350   : > { %v832_v15 = vpop.eup %831 }
 0x351   : > { %v587_v16 = vmul.f32 %v832_v15, %v585_v14  ;;  %vm593_vm7 = vweird.f32 %v832_v15 }
 0x352   : > { %vm594_vm9 = vmor %vm592_vm8, %vm593_vm7 }
 0x353   : > { %v588_v17 = vmul.f32 %v832_v15, %v587_v16 }
 0x355   : > { %v589_v18 = vmul.f32 0.5, %v588_v17 }
 0x357   : > { %v590_v19 = vsub.f32 1.5, %v589_v18 }
 0x359   : > { %v591_v20 = vmul.f32 %v832_v15, %v590_v19 }
 0x35b   : > { %v595_v22 = vsel %vm594_vm9, %v832_v15, %v591_v20 }
 0x35c   : > { %v596_v23 = vmul.f32 %v595_v22, %v579_v5 }
 0x35e   : > { %v600_v24 = vmul.f32 %v819_v21, %v596_v23 }
 0x360   : > { %v604_v25 = vadd.f32 %v820_v8, %v600_v24 }
 0x362   : > { %767 = vmatmul.msk.f32.vlgmr.msra.gmra.mxu2 %vm439_vm0, %v604_v25 }
 0x3e5   : > { %v633_v35 = vpop.f32.mrf.mxu2 }
 0x3e6   : > { %v634_v36 = vadd.f32 %v821_v34, %v633_v35 }
 0x3e8   : > { %v636_v37 = vmul.f32 %v634_v36, %v634_v36 }
 0x3ea   : > { %v637_v38 = vmul.f32 %v636_v37, %v634_v36 }
 0x3ec   : > { %v638_v39 = vmul.f32 0.044715, %v637_v38 }
 0x3ee   : > { %v639_v40 = vadd.f32 %v638_v39, %v634_v36 }
 0x3f0   : > { %v640_v41 = vmul.f32 0.7978846, %v639_v40 }
 0x3f2   : > { %833 = vtanh.f32 %v640_v41 }
 0x3f8   : > { %v834_v42 = vpop.eup %833 }
 0x3f9   : > { %v642_v43 = vadd.f32 1.0, %v834_v42 }
 0x3fb   : > { %v643_v44 = vmul.f32 0.5, %v642_v43 }
 0x3fd   : > { %v644_v45 = vmul.f32 %v643_v44, %v634_v36 }
 0x3ff   : > { %768 = vmatmul.msk.f32.vlgmr.msra.gmra.mxu3 %vm657_vm10, %v644_v45 }
 0x482   : > { %v678_v47 = vpop.f32.mrf.mxu3 }
 0x483   : > { %v679_v48 = vadd.f32 %v822_v46, %v678_v47 }
 0x485   : > { %v681_v49 = vadd.f32 %v679_v48, %v1060_v1 }
 0x487   : > { %682 = vst.msk [vmem:[%s431_s16] sm:$0xff] %vm439_vm0, %v681_v49 }
 0x488   : > { %862 = shalt.err (!%p859_p3)
}
 0x489   : > { %773 = dma.vmem_to_hbm [thread:$0]  (%p1009_p5), %s697_s0, 128, %s699_s2, %s684_s29  }
 0x48a PF: > { %p779_p4 = scmp.ge.s32.totalorder %s897_s28, 2  ;;  %s710_s1 = sand.u32 1, %s885_s25  }
 0x48b   : > { %s711_s15 = scalar_lea.sflag [#allocation4], %s710_s1 }
 0x48c   : > { %p776_p7 = pnand %p779_p4, %p1013_p6 }
 0x48e   : > { %p777_p8 = pneg %p776_p7 }
 0x490   : > { %880 = dma.done.wait (%p777_p8), %s711_s15, 128  }
 0x491   : > { %882 = vsyncadd (%p777_p8), %s711_s15, 4294967168  ;;  %p23_p9 = scmp.ge.s32.totalorder %s996_s14, 4   ;;  %s1175_s25 = smov %s889_s26 }
 0x492   : > { %s1176_s26 = smov %s893_s27  ;;  %s1177_s27 = smov %s1007_s17 }
 0x493   : > { %s1178_s28 = smov %s996_s14  ;;  %25 = sbr.rel (!%p23_p9) target bundleno = 8 (0x8), region = 107 }
 0x498   :  { %717 = vsyncpa [#allocation4], 1 }
 0x499   :  { %719 = vsyncpa [#allocation4 + $0x1], 1 }

</bundles_post_ra>
